<compile_context>
chip_gen: v6e
topology: v6e:2x2x1
jax: 0.10.0
libtpu: 0.0.40
codegen_flags: <defaults>
</compile_context>

<pallas_src>
import jax
import jax.numpy as jnp
from jax.experimental import pallas as pl
from jax.experimental.pallas import tpu as pltpu


# ---------------------------------------------------------------------------
# Kernels
# ---------------------------------------------------------------------------
def ffn_resident_kernel(x_ref, w1_ref, b1_ref, w2_ref, b2_ref, o_ref):
    # x_ref: (tm, E), w1_ref: (E, H), b1_ref: (1, H) f32, w2_ref: (H, E),
    # b2_ref: (1, E) f32, o_ref: (tm, E). Weights are resident (constant index map).
    xv = x_ref[...].astype(w1_ref.dtype)                      # cast on VPU (no-op if same dtype)
    h = jnp.dot(xv, w1_ref[...], preferred_element_type=jnp.float32)
    h = jnp.maximum(h + b1_ref[...], 0.0)                     # bias1 + ReLU
    o = jnp.dot(h.astype(w2_ref.dtype), w2_ref[...],
                preferred_element_type=jnp.float32)
    o_ref[...] = (o + b2_ref[...]).astype(o_ref.dtype)
    # TODO(synk): Dropout omitted (eval-mode identity); training parity would need
    # pltpu.prng_seed + pltpu.prng_random_bits masking + 1/(1-p) scaling here.


def ffn_tiled_kernel(x_ref, w1_ref, b1_ref, w2_ref, b2_ref, o_ref, acc_ref):
    # H-streaming path: grid = (M//tm, H//th), accumulator (tm, E) f32 in VMEM.
    j = pl.program_id(1)

    @pl.when(j == 0)
    def _():
        acc_ref[...] = jnp.zeros_like(acc_ref)

    xv = x_ref[...].astype(w1_ref.dtype)
    # First matmul for this H-chunk: (tm, E) @ (E, th) -> f32 (tm, th).
    h = jnp.dot(xv, w1_ref[...], preferred_element_type=jnp.float32)
    h = jnp.maximum(h + b1_ref[...], 0.0)                     # exact: E not tiled
    # Second matmul, accumulated over H-chunks: (tm, th) @ (th, E) -> f32 (tm, E).
    acc_ref[...] += jnp.dot(h.astype(w2_ref.dtype), w2_ref[...],
                            preferred_element_type=jnp.float32)

    @pl.when(j == pl.num_programs(1) - 1)
    def _():
        o_ref[...] = (acc_ref[...] + b2_ref[...]).astype(o_ref.dtype)
    # TODO(synk): if profiles show exposed weight DMA at j boundaries on 128 MiB
    # parts, add pipeline_mode=pl.Buffered(3) on the W1/W2 BlockSpecs.


# ---------------------------------------------------------------------------
# Generation-aware configuration
# ---------------------------------------------------------------------------
def _hw_config():
    kind = ""
    try:
        kind = jax.devices()[0].device_kind.lower()
    except Exception:
        pass
    vmem_cap = None
    try:
        vmem_cap = int(pltpu.get_tpu_info().vmem_capacity_bytes)
    except Exception:
        pass
    if vmem_cap is None:
        vmem_cap = 64 * 1024 * 1024 if "v7" in kind else 128 * 1024 * 1024

    if "v5 lite" in kind or "v5e" in kind or "v5lite" in kind:
        # v5e is already MXU-bound around tm~256; bigger tiles just burn VMEM.
        tm_target, th_target = 256, 512
    elif "v7" in kind or vmem_cap <= 96 * 1024 * 1024:
        # v7x: 64 MiB VMEM/TC is the binding constraint.
        tm_target, th_target = 512, 512
    else:
        # v6e / unknown 128 MiB part: weight arithmetic intensity = tm FLOPs/byte,
        # needs tm >~ 650 to be MXU-bound.
        tm_target, th_target = 768, 1024

    vmem_limit = min(int(vmem_cap * 0.82), 100 * 1024 * 1024)
    # Budget for keeping both weight matrices resident (counts double-buffering
    # plus x/out/acc headroom).
    resident_budget = max(vmem_limit // 3, 8 * 1024 * 1024)
    return dict(tm_target=tm_target, th_target=th_target,
                vmem_limit=vmem_limit, resident_budget=resident_budget)


def _pick_row_tile(M, target):
    """Largest sublane-aligned tile <= target dividing M (prefers 256/128-aligned)."""
    if M <= target:
        return M
    for align in (256, 128, 64, 32, 16, 8):
        t = (target // align) * align
        while t >= align:
            if M % t == 0:
                return t
            t -= align
    return M  # no 8-aligned divisor: take full rows (always a valid block)


def _pick_hidden_tile(H, target):
    """Hidden-dim tile: must be a multiple of 128 (lane width) or the full H."""
    if H <= target or H % 128 != 0:
        return H
    t = (target // 128) * 128
    while t >= 128:
        if H % t == 0:
            return t
        t -= 128
    return H


# ---------------------------------------------------------------------------
# Wrapper
# ---------------------------------------------------------------------------
def feed_forward(x, w1, b1, w2, b2, *, out_dtype=None, tm_target=None,
                 th_target=None, force_tiled=False):
    """x: (B, T, E). w1: (E, H), b1: (H,), w2: (H, E), b2: (E,).

    Pass w1/w2 already stored in bf16 for the native MXU path — the wrapper does
    NOT cast weights per call (that would add a full weight sweep of HBM traffic).
    Activations are cast to the weight dtype inside the kernel.
    """
    B, T, E = x.shape
    H = w1.shape[1]
    M = B * T
    out_dtype = x.dtype if out_dtype is None else out_dtype

    cfg = _hw_config()
    tm_target = cfg["tm_target"] if tm_target is None else tm_target
    th_target = cfg["th_target"] if th_target is None else th_target

    tm = _pick_row_tile(M, tm_target)
    if tm == M and M >= 512 and (M // 2) % 8 == 0:
        tm = M // 2  # keep >= 2 row tiles so both TensorCores stay busy (megacore)
    assert M % tm == 0

    x2 = x.reshape(M, E)                       # no dtype cast here (done in-kernel)
    b1_2 = b1.reshape(1, H).astype(jnp.float32)
    b2_2 = b2.reshape(1, E).astype(jnp.float32)

    weight_bytes = 2 * E * H * jnp.dtype(w1.dtype).itemsize
    resident = (not force_tiled) and (weight_bytes <= cfg["resident_budget"])

    if resident:
        # Weights DMA'd exactly once (constant index map); no accumulator needed.
        grid_spec = pltpu.PrefetchScalarGridSpec(
            num_scalar_prefetch=0,
            grid=(M // tm,),
            in_specs=[
                pl.BlockSpec((tm, E), lambda i: (i, 0)),   # x rows
                pl.BlockSpec((E, H), lambda i: (0, 0)),    # W1 (resident)
                pl.BlockSpec((1, H), lambda i: (0, 0)),    # b1
                pl.BlockSpec((H, E), lambda i: (0, 0)),    # W2 (resident)
                pl.BlockSpec((1, E), lambda i: (0, 0)),    # b2
            ],
            out_specs=pl.BlockSpec((tm, E), lambda i: (i, 0)),
        )
        kernel = ffn_resident_kernel
        dim_sem = ("parallel",)
    else:
        th = _pick_hidden_tile(H, th_target)
        assert H % th == 0
        grid_spec = pltpu.PrefetchScalarGridSpec(
            num_scalar_prefetch=0,
            grid=(M // tm, H // th),
            in_specs=[
                pl.BlockSpec((tm, E), lambda i, j: (i, 0)),   # x rows (const over j)
                pl.BlockSpec((E, th), lambda i, j: (0, j)),   # W1 H-chunk
                pl.BlockSpec((1, th), lambda i, j: (0, j)),   # b1 H-chunk
                pl.BlockSpec((th, E), lambda i, j: (j, 0)),   # W2 H-chunk
                pl.BlockSpec((1, E), lambda i, j: (0, 0)),    # b2 (constant)
            ],
            out_specs=pl.BlockSpec((tm, E), lambda i, j: (i, 0)),
            scratch_shapes=[pltpu.VMEM((tm, E), jnp.float32)],  # f32 accumulator
        )
        kernel = ffn_tiled_kernel
        dim_sem = ("parallel", "arbitrary")

    out = pl.pallas_call(
        kernel,
        out_shape=jax.ShapeDtypeStruct((M, E), out_dtype),
        grid_spec=grid_spec,
        compiler_params=pltpu.CompilerParams(
            dimension_semantics=dim_sem,
            vmem_limit_bytes=cfg["vmem_limit"],
        ),
    )(x2, w1, b1_2, w2, b2_2)
    return out.reshape(B, T, E)


# ---------------------------------------------------------------------------
# References
# ---------------------------------------------------------------------------
def feed_forward_ref(x, w1, b1, w2, b2):
    """Pure-JAX reference with the same mixed precision as the kernel
    (matmuls in the stored weight dtype, f32 accumulation, f32 biases)."""
    cd = w1.dtype
    h = jnp.dot(x.astype(cd), w1, preferred_element_type=jnp.float32)
    h = jnp.maximum(h + b1.astype(jnp.float32), 0.0)
    o = jnp.dot(h.astype(cd), w2, preferred_element_type=jnp.float32)
    return (o + b2.astype(jnp.float32)).astype(x.dtype)


def feed_forward_ref_f32(x, w1, b1, w2, b2):
    h = jnp.maximum(x @ w1 + b1, 0.0)
    return h @ w2 + b2


# ---------------------------------------------------------------------------
# Demo / self-test
# ---------------------------------------------------------------------------
if __name__ == "__main__":
    B, T, E = 2, 8, 32
    H = 4 * E  # 128

    key = jax.random.PRNGKey(0)
    kx, kw1, kb1, kw2, kb2 = jax.random.split(key, 5)

    # nn.Linear-style uniform(-1/sqrt(fan_in), +1/sqrt(fan_in)) init.
    bound1 = 1.0 / jnp.sqrt(E)
    bound2 = 1.0 / jnp.sqrt(H)
    x = jax.random.normal(kx, (B, T, E), dtype=jnp.float32)
    w1 = jax.random.uniform(kw1, (E, H), minval=-bound1, maxval=bound1, dtype=jnp.float32)
    b1 = jax.random.uniform(kb1, (H,), minval=-bound1, maxval=bound1, dtype=jnp.float32)
    w2 = jax.random.uniform(kw2, (H, E), minval=-bound2, maxval=bound2, dtype=jnp.float32)
    b2 = jax.random.uniform(kb2, (E,), minval=-bound2, maxval=bound2, dtype=jnp.float32)

    # Store weights in bf16 ONCE (model-load time), not per call.
    w1_bf16 = w1.astype(jnp.bfloat16)
    w2_bf16 = w2.astype(jnp.bfloat16)

    # Path 1: weights-resident fast path (chosen automatically at these shapes).
    out = jax.block_until_ready(feed_forward(x, w1_bf16, b1, w2_bf16, b2))
    assert out.shape == (B, T, E)
    ref_mixed = feed_forward_ref(x, w1_bf16, b1, w2_bf16, b2)
    assert jnp.allclose(out, ref_mixed, atol=2e-3, rtol=2e-3), \
        "mismatch vs mixed-precision reference (resident path)"
    ref_f32 = feed_forward_ref_f32(x, w1, b1, w2, b2)
    assert jnp.allclose(out, ref_f32, atol=5e-2, rtol=5e-2), \
        "mismatch vs f32 reference (resident path)"

    # Path 2: H-tiled streaming path (forced, with multiple hidden chunks).
    E2, H2 = 128, 512
    x2 = jax.random.normal(kx, (2, 32, E2), dtype=jnp.float32)
    w1b = jax.random.uniform(kw1, (E2, H2), minval=-0.05, maxval=0.05,
                             dtype=jnp.float32).astype(jnp.bfloat16)
    b1b = jax.random.uniform(kb1, (H2,), minval=-0.05, maxval=0.05, dtype=jnp.float32)
    w2b = jax.random.uniform(kw2, (H2, E2), minval=-0.05, maxval=0.05,
                             dtype=jnp.float32).astype(jnp.bfloat16)
    b2b = jax.random.uniform(kb2, (E2,), minval=-0.05, maxval=0.05, dtype=jnp.float32)
    out2 = jax.block_until_ready(
        feed_forward(x2, w1b, b1b, w2b, b2b,
                     force_tiled=True, tm_target=32, th_target=256))
    ref2 = feed_forward_ref(x2, w1b, b1b, w2b, b2b)
    assert out2.shape == x2.shape
    assert jnp.allclose(out2, ref2, atol=2e-3, rtol=2e-3), \
        "mismatch vs mixed-precision reference (tiled path)"

    print("KERNEL_OK")
</pallas_src>

<mosaic_0001>
module attributes {stable_mosaic.version = 11 : i64} {
  func.func @ffn_resident_kernel(%arg0: i32, %arg1: memref<16x32xf32, #tpu.memory_space<vmem>>, %arg2: memref<32x128xbf16, #tpu.memory_space<vmem>>, %arg3: memref<1x128xf32, #tpu.memory_space<vmem>>, %arg4: memref<128x32xbf16, #tpu.memory_space<vmem>>, %arg5: memref<1x32xf32, #tpu.memory_space<vmem>>, %arg6: memref<16x32xf32, #tpu.memory_space<vmem>>) attributes {dimension_semantics = [#tpu.dimension_semantics<parallel>], iteration_bounds = array<i64: 1>, scalar_prefetch = 0 : i64, scratch_operands = 0 : i64, tpu.core_type = #tpu.core_type<tc>, window_params = [{transform_indices = @transform_0, window_bounds = array<i64: 16, 32>}, {pipeline_mode = #tpu.pipeline_mode<synchronous>, transform_indices = @transform_1, window_bounds = array<i64: 32, 128>}, {pipeline_mode = #tpu.pipeline_mode<synchronous>, transform_indices = @transform_2, window_bounds = array<i64: 1, 128>}, {pipeline_mode = #tpu.pipeline_mode<synchronous>, transform_indices = @transform_3, window_bounds = array<i64: 128, 32>}, {pipeline_mode = #tpu.pipeline_mode<synchronous>, transform_indices = @transform_4, window_bounds = array<i64: 1, 32>}, {transform_indices = @transform_5, window_bounds = array<i64: 16, 32>}]} {
    %c0 = arith.constant 0 : index
    %c0_0 = arith.constant 0 : index
    %0 = vector.load %arg1[%c0, %c0_0] : memref<16x32xf32, #tpu.memory_space<vmem>>, vector<16x32xf32>
    %1 = arith.truncf %0 : vector<16x32xf32> to vector<16x32xbf16>
    %c0_1 = arith.constant 0 : index
    %c0_2 = arith.constant 0 : index
    %2 = vector.load %arg2[%c0_1, %c0_2] : memref<32x128xbf16, #tpu.memory_space<vmem>>, vector<32x128xbf16>
    %cst = arith.constant dense<0.000000e+00> : vector<16x128xf32>
    %3 = tpu.matmul %1, %2, %cst {dimension_numbers = #tpu.dot_dimension_numbers<[1], [0], [0], [1], [0, 0, 1, 1], [], []>} : vector<16x32xbf16>, vector<32x128xbf16>, vector<16x128xf32> -> vector<16x128xf32>
    %c0_3 = arith.constant 0 : index
    %c0_4 = arith.constant 0 : index
    %4 = vector.load %arg3[%c0_3, %c0_4] : memref<1x128xf32, #tpu.memory_space<vmem>>, vector<1x128xf32>
    %5 = vector.broadcast %4 : vector<1x128xf32> to vector<16x128xf32>
    %6 = arith.addf %3, %5 : vector<16x128xf32>
    %cst_5 = arith.constant 0.000000e+00 : f32
    %7 = vector.broadcast %cst_5 : f32 to vector<16x128xf32>
    %8 = arith.maximumf %6, %7 : vector<16x128xf32>
    %9 = arith.truncf %8 : vector<16x128xf32> to vector<16x128xbf16>
    %c0_6 = arith.constant 0 : index
    %c0_7 = arith.constant 0 : index
    %10 = vector.load %arg4[%c0_6, %c0_7] : memref<128x32xbf16, #tpu.memory_space<vmem>>, vector<128x32xbf16>
    %cst_8 = arith.constant dense<0.000000e+00> : vector<16x32xf32>
    %11 = tpu.matmul %9, %10, %cst_8 {dimension_numbers = #tpu.dot_dimension_numbers<[1], [0], [0], [1], [0, 0, 1, 1], [], []>} : vector<16x128xbf16>, vector<128x32xbf16>, vector<16x32xf32> -> vector<16x32xf32>
    %c0_9 = arith.constant 0 : index
    %c0_10 = arith.constant 0 : index
    %12 = vector.load %arg5[%c0_9, %c0_10] : memref<1x32xf32, #tpu.memory_space<vmem>>, vector<1x32xf32>
    %13 = vector.broadcast %12 : vector<1x32xf32> to vector<16x32xf32>
    %14 = arith.addf %11, %13 : vector<16x32xf32>
    %c0_11 = arith.constant 0 : index
    %c0_12 = arith.constant 0 : index
    %15 = vector.load %arg6[%c0_11, %c0_12] : memref<16x32xf32, #tpu.memory_space<vmem>>, vector<16x32xf32>
    tpu.vector_store %arg6[%c0_11, %c0_12], %14 {strides = array<i32>} : memref<16x32xf32, #tpu.memory_space<vmem>>, vector<16x32xf32>,
    return
  }
  func.func @transform_0(%arg0: i32) -> (i32, i32) {
    %c0_i32 = arith.constant 0 : i32
    %c0_i32_0 = arith.constant 0 : i32
    return %arg0, %c0_i32 : i32, i32
  }
  func.func @transform_1(%arg0: i32) -> (i32, i32) {
    %c0_i32 = arith.constant 0 : i32
    %c0_i32_0 = arith.constant 0 : i32
    %c0_i32_1 = arith.constant 0 : i32
    return %c0_i32, %c0_i32_0 : i32, i32
  }
  func.func @transform_2(%arg0: i32) -> (i32, i32) {
    %c0_i32 = arith.constant 0 : i32
    %c0_i32_0 = arith.constant 0 : i32
    %c0_i32_1 = arith.constant 0 : i32
    return %c0_i32, %c0_i32_0 : i32, i32
  }
  func.func @transform_3(%arg0: i32) -> (i32, i32) {
    %c0_i32 = arith.constant 0 : i32
    %c0_i32_0 = arith.constant 0 : i32
    %c0_i32_1 = arith.constant 0 : i32
    return %c0_i32, %c0_i32_0 : i32, i32
  }
  func.func @transform_4(%arg0: i32) -> (i32, i32) {
    %c0_i32 = arith.constant 0 : i32
    %c0_i32_0 = arith.constant 0 : i32
    %c0_i32_1 = arith.constant 0 : i32
    return %c0_i32, %c0_i32_0 : i32, i32
  }
  func.func @transform_5(%arg0: i32) -> (i32, i32) {
    %c0_i32 = arith.constant 0 : i32
    %c0_i32_0 = arith.constant 0 : i32
    return %arg0, %c0_i32 : i32, i32
  }
}

</mosaic_0001>

<bundles_post_ra>
// kernel: tpu_custom_call.1
= control target key start
LH: loop header
LB: loop body
LE: loop exit
PB: predicated region body
PF: predicated region fallthrough
CT: control target
= control target key end

     0   :  { %v316_v1 = vmov 0.0   ;;  %vm317_vm0 = vmmov 0   ;;  %vm48_vm1 = vcmask 261120   ;;  %s399_s0 = inlined_call_operand.vmem [shape: f32[16,32], index: 0, kind: input, shape index: {}]   ;;  %s400_s1 = inlined_call_operand.vmem [shape: bf16[32,128], index: 1, kind: input, shape index: {}]   ;;  %s401_s2 = inlined_call_operand.vmem [shape: f32[1,128], index: 2, kind: input, shape index: {}]   ;;  %s402_s3 = inlined_call_operand.vmem [shape: bf16[128,32], index: 3, kind: input, shape index: {}]   ;;  %s403_s4 = inlined_call_operand.vmem [shape: f32[1,32], index: 4, kind: input, shape index: {}]   ;;  %s404_s5 = inlined_call_operand.hbm [shape: f32[16,32], index: 5, kind: output, shape index: {}]  }
   0x1   :  { %v284_v0 = vld [vmem:[%s400_s1 + $0x8] sm:$0xff]   ;;  %251 = vmatprep.subr.bf16.mxu0 %v316_v1  ;;  %v285_v2 = vld [vmem:[%s400_s1] sm:$0xff]   ;;  %259 = vmatprep.subr.bf16.mxu1 %v316_v1  ;;  %v286_v5 = vld [vmem:[%s402_s3 + $0x38] sm:$0xff]  }
   0x2   :  { %252 = vmatpush3.bf16.msra.mxu0 %v284_v0  ;;  %255 = vmatprep.mubr.msk.bf16.mxu0 %vm317_vm0, %v316_v1  ;;  %v22_v3 = vld [vmem:[%s399_s0] sm:$0xff]  ;;  %v23_v4 = vld [vmem:[%s399_s0 + $0x8] sm:$0xff]  ;;  %v287_v7 = vld [vmem:[%s402_s3 + $0x30] sm:$0xff]  }
   0x3   :  { %253 = vmatprep.subr.bf16.mxu0 %v316_v1  ;;  %275 = vmatprep.mubr.msk.bf16.mxu1 %vm317_vm0, %v316_v1  ;;  %v24_v6 = vpack.c.bf16 %v23_v4, %v22_v3  ;;  %v288_v8 = vld [vmem:[%s402_s3 + $0x28] sm:$0xff]  }
   0x4   :  { %260 = vmatpush3.bf16.msra.mxu1 %v286_v5 }
   0x5   :  { %261 = vmatprep.subr.bf16.mxu1 %v316_v1 }
   0x6   :  { %254 = vmatpush3.bf16.msra.mxu0 %v285_v2 }
   0x8   :  { %262 = vmatpush3.bf16.msra.mxu1 %v287_v7 }
   0x9   :  { %256 = vmatmul.mubr.msk.bf16.vlgmr.msra.gmra.mxu0 %vm48_vm1, %v24_v6  ;;  %263 = vmatprep.subr.bf16.mxu1 %v316_v1 }
   0xa   :  { %10 = vsyncpa [#allocation3], 0  ;;  %v289_v9 = vld [vmem:[%s402_s3 + $0x20] sm:$0xff]   ;;  %v290_v10 = vld [vmem:[%s402_s3 + $0x18] sm:$0xff]  }
   0xb   :  { %v291_v11 = vld [vmem:[%s402_s3 + $0x10] sm:$0xff]   ;;  %v292_v12 = vld [vmem:[%s402_s3 + $0x8] sm:$0xff]   ;;  %v293_v13 = vld [vmem:[%s402_s3] sm:$0xff]   ;;  %s318_s3 = smov [#allocation2]  }
   0xc   :  { %264 = vmatpush3.bf16.msra.mxu1 %v288_v8  ;;  %v226_v14 = vld [vmem:[%s401_s2] ss:$0 sm:$0xff]  ;;  %s215_s19 = sshll.u32 %s318_s3, 4  ;;  %s216_s19 = int_to_ptr.vmem [resolvable:$true] %s215_s19 }
   0xd   :  { %265 = vmatprep.subr.bf16.mxu1 %v316_v1  ;;  %v230_v24 = vld [vmem:[%s403_s4] ss:$0 sm:$0xff]  ;;  %s294_s2 = scalar_lea.vmem %s216_s19, 256  ;;  %p299_p1 = scmp.lt.s32.totalorder %s216_s19, %s216_s19 }
   0xe   :  { %p295_p0 = scmp.ne.s32.totalorder %s216_s19, %s294_s2  ;;  %p300_p2 = scmp.lt.s32.totalorder %s294_s2, %s294_s2 }
  0x10   :  { %266 = vmatpush3.bf16.msra.mxu1 %v289_v9  ;;  %p301_p3 = por %p300_p2, %p299_p1 }
  0x11   :  { %267 = vmatprep.subr.bf16.mxu1 %v316_v1 }
  0x12   :  { %p302_p4 = pnand %p301_p3, %p295_p0 }
  0x14   :  { %268 = vmatpush3.bf16.msra.mxu1 %v290_v10 }
  0x15   :  { %269 = vmatprep.subr.bf16.mxu1 %v316_v1 }
  0x18   :  { %270 = vmatpush3.bf16.msra.mxu1 %v291_v11 }
  0x19   :  { %271 = vmatprep.subr.bf16.mxu1 %v316_v1 }
  0x1c   :  { %272 = vmatpush3.bf16.msra.mxu1 %v292_v12 }
  0x1d   :  { %273 = vmatprep.subr.bf16.mxu1 %v316_v1 }
  0x20   :  { %274 = vmatpush3.bf16.msra.mxu1 %v293_v13 }
  0xc9   :  { %v86_v15 = vpop.f32.mrf.mxu0 }
  0xca   :  { %v87_v17 = vadd.f32 %v226_v14, %v86_v15 }
  0xcb   :  { %v257_v16 = vpop.f32.mrf.mxu0 }
  0xcc   :  { %v93_v21 = vmax.f32 %v87_v17, 0.0 }
  0xcd   :  { %v89_v18 = vpop.f32.mrf.mxu0 }
  0xce   :  { %v90_v19 = vadd.f32 %v226_v14, %v89_v18 }
  0xcf   :  { %v258_v20 = vpop.f32.mrf.mxu0 }
  0xd0   :  { %v94_v22 = vmax.f32 %v90_v19, 0.0 }
  0xd2   :  { %v95_v23 = vpack.c.bf16 %v94_v22, %v93_v21 }
  0xd4   :  { %276 = vmatmul.mubr.bf16.vlgmr.msra.gmra.mxu1 %v95_v23 }
 0x194   :  { %v201_v25 = vpop.f32.mrf.mxu1 }
 0x195   :  { %v202_v26 = vadd.f32 %v230_v24, %v201_v25 }
 0x196   :  { %v277_v27 = vpop.f32.mrf.mxu1 }
 0x197   :  { %208 = vst.msk [vmem:[#allocation2] sm:$0xff] %vm48_vm1, %v202_v26 }
 0x198   :  { %v204_v28 = vpop.f32.mrf.mxu1 }
 0x199   :  { %v205_v29 = vadd.f32 %v230_v24, %v204_v28 }
 0x19a   :  { %v278_v30 = vpop.f32.mrf.mxu1 }
 0x19b   :  { %209 = vst.msk [vmem:[#allocation2 + $0x8] sm:$0xff] %vm48_vm1, %v205_v29 }
 0x19c   :  { %305 = shalt.err (!%p302_p4)
}
 0x19d   :  { %s319_s4 = smov 128   ;;  %s320_s20 = smov 8  }
 0x19e   :  { %221 = dma.vmem_to_hbm [thread:$0]  %s216_s19, 256, %s404_s5, [#allocation3], %s319_s4, %s319_s4, %s320_s20  }
 0x19f   :  { %314 = dma.done.wait [#allocation3], 256  }
 0x1a0   :  { %315 = vsyncadd [#allocation3], 4294967040 }
 0x1a1   :  { %225 = vsyncpa [#allocation3], 1 }

</bundles_post_ra>
